<compile_context>
chip_gen: v5e
topology: v5e:2x2
jax: 0.10.0
libtpu: 0.0.40
codegen_flags: <defaults>
</compile_context>

<pallas_src>
import functools

import numpy as np
import jax
import jax.numpy as jnp
from jax.experimental import pallas as pl
from jax.experimental.pallas import tpu as pltpu


def _filter_layer2_kernel(x_ref, q_ref, er_ref, eb_ref, p_ref, o_ref):
    # x_ref : (S, GH)  f32   x slab in (seq, group*hidden) layout, constant over seq tiles
    # q_ref : (TS, S)  bf16  rows of the folded real operator Q = irfft∘(i·)∘rfft
    # er_ref: (GH, G)  f32   block indicator: sums each H chunk
    # eb_ref: (G, GH)  f32   block indicator transpose: broadcasts back over each H chunk
    # p_ref : (8, GH)  f32   row0 = wr+1, row1 = wi, row2 = gamma, row3 = beta
    # o_ref : (TS, GH) f32
    eps = 1e-12
    ts = o_ref.shape[0]
    gh, g_cnt = er_ref.shape
    h = gh // g_cnt
    j = pl.program_id(1)

    # One wide MXU matmul: (TS, S) @ (S, G*H) -> (TS, G*H), f32 accumulation.
    # The bf16 cast of the resident slab is VPU filler hidden under the matmul.
    xb = x_ref[...].astype(jnp.bfloat16)
    qy = jnp.dot(q_ref[...], xb, preferred_element_type=jnp.float32)

    # f32 residual tile sliced from the same resident slab (no second x stream).
    start = pl.multiple_of(j * ts, ts)
    xr = x_ref[pl.ds(start, ts), :]

    wr1 = p_ref[0:1, :]   # real diag of the filter + 1 (residual folded in)
    wi = p_ref[1:2, :]    # imag diag of the filter
    gam = p_ref[2:3, :]   # LayerNorm weight
    bet = p_ref[3:4, :]   # LayerNorm bias

    # filter + dropout(identity, eval) + residual, all in f32
    z = xr * wr1 + qy * wi                                          # (TS, GH)

    # TF-style LayerNorm over each H chunk, two-pass variance.  The per-chunk
    # reduce/broadcast uses tiny 0/1 indicator matmuls so the elementwise work
    # stays lane-dense at width G*H.
    inv_h = 1.0 / h
    er = er_ref[...]
    eb = eb_ref[...]
    u = jnp.dot(z, er, preferred_element_type=jnp.float32) * inv_h          # (TS, G)
    dzu = z - jnp.dot(u, eb, preferred_element_type=jnp.float32)            # (TS, GH)
    var = jnp.dot(dzu * dzu, er, preferred_element_type=jnp.float32) * inv_h
    rstd = jax.lax.rsqrt(var + eps)                                         # (TS, G)
    o_ref[...] = gam * (dzu * jnp.dot(rstd, eb,
                                      preferred_element_type=jnp.float32)) + bet


def _vmem_budget():
    """Per-generation VMEM budget, leaving headroom for compiler scratch."""
    cap = 64 << 20
    try:
        cap = int(pltpu.get_tpu_info().vmem_capacity_bytes)
    except Exception:
        # Only affects the default budget; never masks kernel/lowering errors.
        pass
    # v7x (64 MiB physical) -> 48 MiB; v5e/v6e (128 MiB) -> 96 MiB.
    return min((cap * 3) // 4, 100 << 20)


def _pick_group(B, H, S, budget):
    """Batch rows folded per grid step into the matmul N dimension (N = G*H)."""
    lane_ok = [g for g in range(1, B + 1)
               if B % g == 0 and (g == B or (g * H) % 128 == 0)]
    # f32 slab (double-buffered) + in-kernel bf16 cast ~ 10 bytes / element.
    for g in sorted(lane_ok, reverse=True):
        if 10 * S * g * H <= budget // 2:
            return g
    return min(lane_ok)   # smallest lane-legal group (VMEM-tight only for huge B*H)


def _vmem_bytes(S, GH, G, TS):
    return (2 * S * GH * 4        # f32 x slab (double-buffered, constant per group)
            + S * GH * 2          # in-kernel bf16 cast of the slab
            + 2 * TS * S * 2      # bf16 Q tile (double-buffered)
            + 2 * TS * GH * 4     # f32 output tile (double-buffered)
            + 2 * 8 * GH * 4      # packed params
            + 4 * GH * G * 4      # reduce / broadcast indicators
            + 4 * TS * GH * 4)    # f32 intermediates (qy, z, dzu, ...)


def _pick_seq_tile(S, GH, G, budget):
    # multiples of 16 only (bf16 sublane packing); < S keeps >= 2 seq steps for
    # pipelining and v7x dual-TC when S >= 32.
    cands = [ts for ts in (1024, 512, 256, 128, 64, 32, 16) if ts < S and S % ts == 0]
    for ts in cands:                      # descending: biggest tile within budget
        if _vmem_bytes(S, GH, G, ts) <= budget:
            return ts
    if cands:
        return cands[-1]
    return S                              # tiny-S case: single full-seq tile


def _build_q_operator(S):
    """Real SxS operator Q such that irfft(diag(i)·rfft(x)) == Q @ x (ortho)."""
    L = S // 2 + 1
    t = np.arange(S)
    k = np.arange(L)
    inv_sqrt = 1.0 / np.sqrt(S)
    ang_f = 2.0 * np.pi * np.outer(k, t) / S              # (L, S)
    Fr = np.cos(ang_f) * inv_sqrt
    Fi = -np.sin(ang_f) * inv_sqrt
    c = np.full((L,), 2.0)
    c[0] = 1.0
    if S % 2 == 0:
        c[-1] = 1.0                                       # Nyquist bin
    ang_i = 2.0 * np.pi * np.outer(t, k) / S              # (S, L)
    IMr = np.cos(ang_i) * c[None, :] * inv_sqrt
    IMi = -np.sin(ang_i) * c[None, :] * inv_sqrt
    # irfft discards the imaginary part of DC (and Nyquist for even S).
    IMi[:, 0] = 0.0
    if S % 2 == 0:
        IMi[:, -1] = 0.0
    # P = IMr@Fr + IMi@Fi is exactly the identity (irfft∘rfft) — not materialized.
    Q = IMi @ Fr - IMr @ Fi                               # (S, S), float64
    return Q.astype(np.float32)


@functools.lru_cache(maxsize=8)
def _q_operator_bf16(S):
    """Device-resident bf16 Q operator, built once per sequence length."""
    return jnp.asarray(_build_q_operator(S), dtype=jnp.bfloat16)


def filter_layer2(x, complex_weight, ln_weight, ln_bias):
    """x: (B, S, H) f32; complex_weight: (n_block, d, d, 2) with d = H // n_block."""
    B, S, H = x.shape
    n_block = complex_weight.shape[0]
    d = H // n_block

    # Diagonal of the complex weight ('blnd,ndd->blnd' == per-channel diag multiply).
    idx = jnp.arange(d)
    diag = complex_weight[:, idx, idx, :]                 # (n_block, d, 2)
    wr = diag[..., 0].reshape(H).astype(jnp.float32)
    wi = diag[..., 1].reshape(H).astype(jnp.float32)
    gamma = ln_weight.reshape(H).astype(jnp.float32)
    beta = ln_bias.reshape(H).astype(jnp.float32)

    budget = _vmem_budget()
    G = _pick_group(B, H, S, budget)                      # batch rows per group
    GH = G * H
    n_groups = B // G
    TS = _pick_seq_tile(S, GH, G, budget)

    # x -> (seq, batch*hidden): Q is reused across the whole batch, MXU N width
    # and output lanes become G*H instead of H.
    x_sn = jnp.transpose(x.astype(jnp.float32), (1, 0, 2)).reshape(S, B * H)

    # Packed per-channel params tiled across the G batch rows of a group.
    params = jnp.concatenate(
        [jnp.stack([jnp.tile(wr + 1.0, G), jnp.tile(wi, G),
                    jnp.tile(gamma, G), jnp.tile(beta, G)], axis=0),
         jnp.zeros((4, GH), jnp.float32)], axis=0)        # (8, GH)

    # Block indicator matrices for the per-H-chunk LayerNorm reduce / broadcast.
    eb = jnp.repeat(jnp.eye(G, dtype=jnp.float32), H, axis=1)   # (G, GH)
    er = eb.T                                                    # (GH, G)

    q_bf16 = _q_operator_bf16(S)                                 # (S, S) bf16, cached

    grid = (n_groups, S // TS)
    out_sn = pl.pallas_call(
        _filter_layer2_kernel,
        out_shape=jax.ShapeDtypeStruct((S, B * H), jnp.float32),
        grid=grid,
        in_specs=[
            pl.BlockSpec((S, GH), lambda g, j: (0, g)),   # f32 x slab, constant over seq
            pl.BlockSpec((TS, S), lambda g, j: (j, 0)),   # Q rows for this seq tile
            pl.BlockSpec((GH, G), lambda g, j: (0, 0)),   # reduce indicator
            pl.BlockSpec((G, GH), lambda g, j: (0, 0)),   # broadcast indicator
            pl.BlockSpec((8, GH), lambda g, j: (0, 0)),   # packed params
        ],
        out_specs=pl.BlockSpec((TS, GH), lambda g, j: (j, g)),
        compiler_params=pltpu.CompilerParams(
            dimension_semantics=("parallel", "parallel"),
            vmem_limit_bytes=budget),
    )(x_sn, q_bf16, er, eb, params)

    return jnp.transpose(out_sn.reshape(S, B, H), (1, 0, 2))


def _reference(x, complex_weight, ln_weight, ln_bias):
    """Pure-JAX reference replicating the PyTorch forward (eval mode)."""
    B, S, H = x.shape
    n = complex_weight.shape[0]
    A = jnp.fft.rfft(x, axis=1, norm="ortho")                  # (B, L, H) complex
    A = A.reshape(B, S // 2 + 1, n, H // n)
    Bc = complex_weight[..., 0] + 1j * complex_weight[..., 1]  # (n, d, d)
    C = jnp.einsum("blnd,ndd->blnd", A, Bc)                    # diagonal of Bc
    C = C.reshape(B, S // 2 + 1, H)
    y = jnp.fft.irfft(C, n=S, axis=1, norm="ortho")
    z = y + x                                                  # dropout == identity (eval)
    u = jnp.mean(z, axis=-1, keepdims=True)
    s = jnp.mean((z - u) ** 2, axis=-1, keepdims=True)
    zn = (z - u) / jnp.sqrt(s + 1e-12)
    return ln_weight * zn + ln_bias


if __name__ == "__main__":
    # Small shapes consistent with the module: batch=2, seq=8, hidden=32, n_block=4
    B, S, H, N_BLOCK = 2, 8, 32, 4
    d = H // N_BLOCK

    key = jax.random.PRNGKey(0)
    k_x, k_w = jax.random.split(key)
    x = jax.random.normal(k_x, (B, S, H), dtype=jnp.float32)
    complex_weight = 0.02 * jax.random.normal(k_w, (N_BLOCK, d, d, 2), dtype=jnp.float32)
    ln_weight = jnp.ones((H,), dtype=jnp.float32)
    ln_bias = jnp.zeros((H,), dtype=jnp.float32)

    out = filter_layer2(x, complex_weight, ln_weight, ln_bias)
    out = jax.block_until_ready(out)

    ref = _reference(x, complex_weight, ln_weight, ln_bias)
    assert out.shape == (B, S, H)
    # bf16 MXU operands -> slightly relaxed tolerance vs the f32 FFT reference.
    assert np.allclose(np.asarray(out), np.asarray(ref), atol=5e-3, rtol=5e-3), \
        "Pallas kernel mismatch vs JAX reference"

    print("KERNEL_OK")
</pallas_src>

<mosaic_0001>
module attributes {stable_mosaic.version = 11 : i64} {
  func.func @_filter_layer2_kernel(%arg0: i32, %arg1: i32, %arg2: memref<8x64xf32, #tpu.memory_space<vmem>>, %arg3: memref<8x8xbf16, #tpu.memory_space<vmem>>, %arg4: memref<64x2xf32, #tpu.memory_space<vmem>>, %arg5: memref<2x64xf32, #tpu.memory_space<vmem>>, %arg6: memref<8x64xf32, #tpu.memory_space<vmem>>, %arg7: memref<8x64xf32, #tpu.memory_space<vmem>>) attributes {dimension_semantics = [#tpu.dimension_semantics<parallel>, #tpu.dimension_semantics<parallel>], iteration_bounds = array<i64: 1, 1>, scalar_prefetch = 0 : i64, scratch_operands = 0 : i64, tpu.core_type = #tpu.core_type<tc>, window_params = [{transform_indices = @transform_0, window_bounds = array<i64: 8, 64>}, {transform_indices = @transform_1, window_bounds = array<i64: 8, 8>}, {pipeline_mode = #tpu.pipeline_mode<synchronous>, transform_indices = @transform_2, window_bounds = array<i64: 64, 2>}, {pipeline_mode = #tpu.pipeline_mode<synchronous>, transform_indices = @transform_3, window_bounds = array<i64: 2, 64>}, {pipeline_mode = #tpu.pipeline_mode<synchronous>, transform_indices = @transform_4, window_bounds = array<i64: 8, 64>}, {transform_indices = @transform_5, window_bounds = array<i64: 8, 64>}]} {
    %c0 = arith.constant 0 : index
    %c0_0 = arith.constant 0 : index
    %0 = vector.load %arg2[%c0, %c0_0] : memref<8x64xf32, #tpu.memory_space<vmem>>, vector<8x64xf32>
    %1 = arith.truncf %0 : vector<8x64xf32> to vector<8x64xbf16>
    %c0_1 = arith.constant 0 : index
    %c0_2 = arith.constant 0 : index
    %2 = vector.load %arg3[%c0_1, %c0_2] : memref<8x8xbf16, #tpu.memory_space<vmem>>, vector<8x8xbf16>
    %cst = arith.constant dense<0.000000e+00> : vector<8x64xf32>
    %3 = tpu.matmul %2, %1, %cst {dimension_numbers = #tpu.dot_dimension_numbers<[1], [0], [0], [1], [0, 0, 1, 1], [], []>} : vector<8x8xbf16>, vector<8x64xbf16>, vector<8x64xf32> -> vector<8x64xf32>
    %c8_i32 = arith.constant 8 : i32
    %4 = arith.muli %arg1, %c8_i32 : i32
    %5 = tpu.assume_multiple %4, 8 : i32
    %6 = arith.index_cast %5 : i32 to index
    %c0_3 = arith.constant 0 : index
    %7 = vector.load %arg2[%6, %c0_3] : memref<8x64xf32, #tpu.memory_space<vmem>>, vector<8x64xf32>
    %c0_4 = arith.constant 0 : index
    %c0_5 = arith.constant 0 : index
    %8 = vector.load %arg6[%c0_4, %c0_5] : memref<8x64xf32, #tpu.memory_space<vmem>>, vector<1x64xf32>
    %c1 = arith.constant 1 : index
    %c0_6 = arith.constant 0 : index
    %9 = vector.load %arg6[%c1, %c0_6] : memref<8x64xf32, #tpu.memory_space<vmem>>, vector<1x64xf32>
    %c2 = arith.constant 2 : index
    %c0_7 = arith.constant 0 : index
    %10 = vector.load %arg6[%c2, %c0_7] : memref<8x64xf32, #tpu.memory_space<vmem>>, vector<1x64xf32>
    %c3 = arith.constant 3 : index
    %c0_8 = arith.constant 0 : index
    %11 = vector.load %arg6[%c3, %c0_8] : memref<8x64xf32, #tpu.memory_space<vmem>>, vector<1x64xf32>
    %12 = vector.broadcast %8 : vector<1x64xf32> to vector<8x64xf32>
    %13 = arith.mulf %7, %12 : vector<8x64xf32>
    %14 = vector.broadcast %9 : vector<1x64xf32> to vector<8x64xf32>
    %15 = arith.mulf %3, %14 : vector<8x64xf32>
    %16 = arith.addf %13, %15 : vector<8x64xf32>
    %c0_9 = arith.constant 0 : index
    %c0_10 = arith.constant 0 : index
    %17 = vector.load %arg4[%c0_9, %c0_10] : memref<64x2xf32, #tpu.memory_space<vmem>>, vector<64x2xf32>
    %c0_11 = arith.constant 0 : index
    %c0_12 = arith.constant 0 : index
    %18 = vector.load %arg5[%c0_11, %c0_12] : memref<2x64xf32, #tpu.memory_space<vmem>>, vector<2x64xf32>
    %cst_13 = arith.constant dense<0.000000e+00> : vector<8x2xf32>
    %19 = tpu.matmul %16, %17, %cst_13 {dimension_numbers = #tpu.dot_dimension_numbers<[1], [0], [0], [1], [0, 0, 1, 1], [], []>} : vector<8x64xf32>, vector<64x2xf32>, vector<8x2xf32> -> vector<8x2xf32>
    %cst_14 = arith.constant 3.125000e-02 : f32
    %20 = vector.broadcast %cst_14 : f32 to vector<8x2xf32>
    %21 = arith.mulf %19, %20 : vector<8x2xf32>
    %cst_15 = arith.constant dense<0.000000e+00> : vector<8x64xf32>
    %22 = tpu.matmul %21, %18, %cst_15 {dimension_numbers = #tpu.dot_dimension_numbers<[1], [0], [0], [1], [0, 0, 1, 1], [], []>} : vector<8x2xf32>, vector<2x64xf32>, vector<8x64xf32> -> vector<8x64xf32>
    %23 = arith.subf %16, %22 : vector<8x64xf32>
    %24 = arith.mulf %23, %23 : vector<8x64xf32>
    %cst_16 = arith.constant dense<0.000000e+00> : vector<8x2xf32>
    %25 = tpu.matmul %24, %17, %cst_16 {dimension_numbers = #tpu.dot_dimension_numbers<[1], [0], [0], [1], [0, 0, 1, 1], [], []>} : vector<8x64xf32>, vector<64x2xf32>, vector<8x2xf32> -> vector<8x2xf32>
    %cst_17 = arith.constant 3.125000e-02 : f32
    %26 = vector.broadcast %cst_17 : f32 to vector<8x2xf32>
    %27 = arith.mulf %25, %26 : vector<8x2xf32>
    %cst_18 = arith.constant 9.99999996E-13 : f32
    %28 = vector.broadcast %cst_18 : f32 to vector<8x2xf32>
    %29 = arith.addf %27, %28 : vector<8x2xf32>
    %30 = math.rsqrt %29 : vector<8x2xf32>
    %cst_19 = arith.constant dense<0.000000e+00> : vector<8x64xf32>
    %31 = tpu.matmul %30, %18, %cst_19 {dimension_numbers = #tpu.dot_dimension_numbers<[1], [0], [0], [1], [0, 0, 1, 1], [], []>} : vector<8x2xf32>, vector<2x64xf32>, vector<8x64xf32> -> vector<8x64xf32>
    %32 = arith.mulf %23, %31 : vector<8x64xf32>
    %33 = vector.broadcast %10 : vector<1x64xf32> to vector<8x64xf32>
    %34 = arith.mulf %33, %32 : vector<8x64xf32>
    %35 = vector.broadcast %11 : vector<1x64xf32> to vector<8x64xf32>
    %36 = arith.addf %34, %35 : vector<8x64xf32>
    %c0_20 = arith.constant 0 : index
    %c0_21 = arith.constant 0 : index
    %37 = vector.load %arg7[%c0_20, %c0_21] : memref<8x64xf32, #tpu.memory_space<vmem>>, vector<8x64xf32>
    tpu.vector_store %arg7[%c0_20, %c0_21], %36 {strides = array<i32>} : memref<8x64xf32, #tpu.memory_space<vmem>>, vector<8x64xf32>,
    return
  }
  func.func @transform_0(%arg0: i32, %arg1: i32) -> (i32, i32) {
    %c0_i32 = arith.constant 0 : i32
    %c0_i32_0 = arith.constant 0 : i32
    return %c0_i32, %arg0 : i32, i32
  }
  func.func @transform_1(%arg0: i32, %arg1: i32) -> (i32, i32) {
    %c0_i32 = arith.constant 0 : i32
    %c0_i32_0 = arith.constant 0 : i32
    return %arg1, %c0_i32 : i32, i32
  }
  func.func @transform_2(%arg0: i32, %arg1: i32) -> (i32, i32) {
    %c0_i32 = arith.constant 0 : i32
    %c0_i32_0 = arith.constant 0 : i32
    %c0_i32_1 = arith.constant 0 : i32
    return %c0_i32, %c0_i32_0 : i32, i32
  }
  func.func @transform_3(%arg0: i32, %arg1: i32) -> (i32, i32) {
    %c0_i32 = arith.constant 0 : i32
    %c0_i32_0 = arith.constant 0 : i32
    %c0_i32_1 = arith.constant 0 : i32
    return %c0_i32, %c0_i32_0 : i32, i32
  }
  func.func @transform_4(%arg0: i32, %arg1: i32) -> (i32, i32) {
    %c0_i32 = arith.constant 0 : i32
    %c0_i32_0 = arith.constant 0 : i32
    %c0_i32_1 = arith.constant 0 : i32
    return %c0_i32, %c0_i32_0 : i32, i32
  }
  func.func @transform_5(%arg0: i32, %arg1: i32) -> (i32, i32) {
    %c0_i32 = arith.constant 0 : i32
    return %arg1, %arg0 : i32, i32
  }
}

</mosaic_0001>

<bundles_post_ra>
// kernel: tpu_custom_call.1
= control target key start
LH: loop header
LB: loop body
LE: loop exit
PB: predicated region body
PF: predicated region fallthrough
CT: control target
= control target key end

     0   :  { %vm29_vm0 = vcmask 1043456   ;;  %vm25_vm1 = vcmask 64512   ;;  %s326_s0 = inlined_call_operand.vmem [shape: f32[8,64], index: 0, kind: input, shape index: {}]   ;;  %s327_s1 = inlined_call_operand.vmem [shape: bf16[8,8], index: 1, kind: input, shape index: {}]   ;;  %s328_s2 = inlined_call_operand.vmem [shape: f32[64,2], index: 2, kind: input, shape index: {}]   ;;  %s329_s3 = inlined_call_operand.vmem [shape: f32[2,64], index: 3, kind: input, shape index: {}]   ;;  %s330_s4 = inlined_call_operand.vmem [shape: f32[8,64], index: 4, kind: input, shape index: {}]   ;;  %s331_s5 = inlined_call_operand.hbm [shape: f32[8,64], index: 5, kind: output, shape index: {}]  }
   0x1   :  { %v22_v0 = vld [vmem:[%s326_s0] sm:$0xff]  ;;  %v65_v1 = vld [vmem:[%s328_s2 + $0x38] sm:$0xff]  ;;  %v64_v3 = vld [vmem:[%s328_s2 + $0x30] sm:$0xff] }
   0x2   :  { %v23_v2 = vpack.c.bf16 %v22_v0, %v22_v0  ;;  %79 = vmatpush.msra.mxu1 %v65_v1  ;;  %133 = vmatpush.msra.mxu3 %v65_v1  ;;  %v63_v4 = vld [vmem:[%s328_s2 + $0x28] sm:$0xff]  ;;  %v24_v6 = vld [vmem:[%s327_s1] sm:$0xf] }
   0x3   :  { %v62_v7 = vld [vmem:[%s328_s2 + $0x20] sm:$0xff] }
   0x4   :  { %v31_v5 = vsel %vm29_vm0, %v23_v2, 0  ;;  %80 = vmatpush.msra.mxu1 %v64_v3  ;;  %134 = vmatpush.msra.mxu3 %v64_v3 }
   0x5   :  { %40 = vmatpush.bf16.msra.mxu0 %v31_v5 }
   0x6   :  { %10 = vsyncpa [#allocation3], 0  ;;  %81 = vmatpush.msra.mxu1 %v63_v4  ;;  %135 = vmatpush.msra.mxu3 %v63_v4  ;;  %v61_v8 = vld [vmem:[%s328_s2 + $0x18] sm:$0xff]  ;;  %v60_v9 = vld [vmem:[%s328_s2 + $0x10] sm:$0xff]  ;;  %vm67_vm2 = vcmask 523264   ;;  %vm96_vm3 = vcmask 1041408  }
   0x7   :  { %v59_v10 = vld [vmem:[%s328_s2 + $0x8] sm:$0xff]  ;;  %v58_v11 = vld [vmem:[%s328_s2] sm:$0xff]  ;;  %vm92_vm4 = vcmask 15360   ;;  %s242_s19 = smov [#allocation2]   ;;  %s193_s23 = sshll.u32 %s331_s5, 4  ;;  %s194_s23 = int_to_ptr.hbm [resolvable:$true] %s193_s23 }
   0x8   :  { %202 = vmatmul.msk.bf16.vlgmr.msra.gmra.mxu0 %vm25_vm1, %v24_v6  ;;  %82 = vmatpush.msra.mxu1 %v62_v7  ;;  %v210_v12 = vld [vmem:[%s330_s4] ss:$0 sm:$0xff]  ;;  %v211_v13 = vld [vmem:[%s330_s4 + $0x1] ss:$0 sm:$0xff]  ;;  %v212_v35 = vld [vmem:[%s330_s4 + $0x2] ss:$0 sm:$0xff] }
   0x9   :  { %136 = vmatpush.msra.mxu3 %v62_v7  ;;  %v54_v14 = vmul.f32 %v210_v12, %v22_v0  ;;  %v66_v19 = vld [vmem:[%s329_s3] sm:$0x3]  ;;  %v213_v38 = vld [vmem:[%s330_s4 + $0x3] ss:$0 sm:$0xff]  ;;  %s191_s20 = sshll.u32 %s242_s19, 4  ;;  %s192_s20 = int_to_ptr.vmem [resolvable:$true] %s191_s20 }
   0xa   :  { %83 = vmatpush.msra.mxu1 %v61_v8  ;;  %204 = vmatpush.msk.msra.mxu2 %vm96_vm3, %v66_v19 }
   0xb   :  { %137 = vmatpush.msra.mxu3 %v61_v8 }
   0xc   :  { %84 = vmatpush.msra.mxu1 %v60_v9  ;;  %207 = vmatpush.msk.msrb.mxu2 %vm96_vm3, %v66_v19 }
   0xd   :  { %138 = vmatpush.msra.mxu3 %v60_v9 }
   0xe   :  { %85 = vmatpush.msra.mxu1 %v59_v10 }
   0xf   :  { %139 = vmatpush.msra.mxu3 %v59_v10 }
  0x10   :  { %86 = vmatpush.msra.mxu1 %v58_v11 }
  0x11   :  { %140 = vmatpush.msra.mxu3 %v58_v11 }
  0x85   :  { %v42_v15 = vpop.f32.mrf.mxu0 }
  0x86   :  { %v56_v16 = vmul.f32 %v211_v13, %v42_v15 }
  0x88   :  { %v57_v17 = vadd.f32 %v56_v16, %v54_v14 }
  0x8a   :  { %203 = vmatmul.msk.f32.vlgmr.msra.gmra.mxu1 %vm67_vm2, %v57_v17 }
  0x8d   :  { %v44_v18 = vpop.f32.mrf.mxu0 }
 0x107   :  { %v88_v20 = vpop.f32.mrf.mxu1 }
 0x108   :  { %v91_v21 = vmul.f32 0.03125, %v88_v20 }
 0x10a   :  { %205 = vmatmul.msk.f32.vlgmr.msra.gmra.mxu2 %vm92_vm4, %v91_v21 }
 0x18d   :  { %v117_v22 = vpop.f32.mrf.mxu2 }
 0x18e   :  { %v120_v23 = vsub.f32 %v57_v17, %v117_v22 }
 0x190   :  { %v121_v24 = vmul.f32 %v120_v23, %v120_v23 }
 0x192   :  { %206 = vmatmul.msk.f32.vlgmr.msra.gmra.mxu3 %vm67_vm2, %v121_v24 }
 0x215   :  { %v142_v25 = vpop.f32.mrf.mxu3 }
 0x216   :  { %v145_v26 = vmul.f32 0.03125, %v142_v25 }
 0x218   :  { %v146_v27 = vadd.f32 1e-12, %v145_v26 }
 0x21a   :  { %214 = vrsqrt.f32 %v146_v27  ;;  %vm153_vm6 = vweird.f32 %v146_v27 }
 0x220   :  { %v215_v28 = vpop.eup %214 }
 0x221   :  { %v148_v29 = vmul.f32 %v215_v28, %v146_v27  ;;  %vm154_vm5 = vweird.f32 %v215_v28 }
 0x222   :  { %vm155_vm7 = vmor %vm153_vm6, %vm154_vm5 }
 0x223   :  { %v149_v30 = vmul.f32 %v215_v28, %v148_v29 }
 0x225   :  { %v150_v31 = vmul.f32 0.5, %v149_v30 }
 0x227   :  { %v151_v32 = vsub.f32 1.5, %v150_v31 }
 0x229   :  { %v152_v33 = vmul.f32 %v215_v28, %v151_v32 }
 0x22b   :  { %v156_v34 = vsel %vm155_vm7, %v215_v28, %v152_v33 }
 0x22c   :  { %208 = vmatmul.msk.f32.vlgmr.msrb.gmra.mxu2 %vm92_vm4, %v156_v34 }
 0x2af   :  { %v177_v36 = vpop.f32.mrf.mxu2 }
 0x2b0   :  { %v180_v37 = vmul.f32 %v177_v36, %v120_v23 }
 0x2b2   :  { %v182_v39 = vmul.f32 %v212_v35, %v180_v37 }
 0x2b4   :  { %v184_v40 = vadd.f32 %v213_v38, %v182_v39 }
 0x2b6   :  { %185 = vst.msk [vmem:[#allocation2] sm:$0xff] %vm67_vm2, %v184_v40 }
 0x2b7   :  { %196 = dma.vmem_to_hbm [thread:$0]  %s192_s20, 128, %s194_s23, [#allocation3]  }
 0x2b8   :  { %240 = dma.done.wait [#allocation3], 128  }
 0x2b9   :  { %241 = vsyncadd [#allocation3], 4294967168 }
 0x2ba   :  { %201 = vsyncpa [#allocation3], 1 }

</bundles_post_ra>
